<compile_context>
chip_gen: v7x
topology: tpu7x:2x2x1
jax: 0.10.0
libtpu: 0.0.40
codegen_flags: <defaults>
</compile_context>

<pallas_src>
import functools
import math

import jax
import jax.numpy as jnp
from jax import lax
from jax.experimental import pallas as pl
from jax.experimental.pallas import tpu as pltpu

F32 = jnp.float32
BF16 = jnp.bfloat16
_NEG_INIT = -1e30                 # finite "-inf" so exp(m_old - m_new) never sees inf-inf
_VMEM_LIMIT = 40 * 1024 * 1024    # safe on v5e/v6e (128 MiB) and v7x (64 MiB physical)


def _dot(a, b, dims):
    return lax.dot_general(a, b, dimension_numbers=(dims, ((), ())),
                           preferred_element_type=F32)


def _q_net(v_bf16, wq1, bq1, wq2, bq2):
    """q = tanh(relu(v @ Wq1 + bq1) @ Wq2 + bq2); bf16 MXU operands, f32 accum."""
    hid = jnp.maximum(_dot(v_bf16, wq1, ((1,), (0,))) + bq1, 0.0)        # (N, H) f32
    return jnp.tanh(_dot(hid.astype(BF16), wq2, ((1,), (0,))) + bq2)     # (N, H) f32


# --------------------------------------------------------------------------- #
# Stage 1: instance classifier.  classes is produced transposed, (C, N), so the
# narrow class axis sits on sublanes and N on lanes -> lane-dense 16 B/instance
# store instead of a 128-lane-padded 512 B/instance store.
# --------------------------------------------------------------------------- #
def _stage1_kernel(x_ref, wi_t_ref, bi_ref, classes_t_ref):
    x = x_ref[...]                                           # (TN, K) bf16
    ct = _dot(wi_t_ref[...], x, ((1,), (1,)))                # (C, TN) f32
    classes_t_ref[...] = ct + bi_ref[...]                    # + bias (C, 1) broadcast


# --------------------------------------------------------------------------- #
# Stage 2: single flash-style pass over N per half.
#   - recompute q from the x tile (x must be streamed anyway for B)
#   - s = q_max @ q^T * scale, stored transposed (C, N) lane-dense (raw logits)
#   - online max / sum-exp / unnormalized B accumulation per half in the
#     (block-index-constant-over-t) output refs; padded tail rows masked out.
# --------------------------------------------------------------------------- #
def _stage2_kernel(x_ref, wq1_ref, bq1_ref, wq2_ref, bq2_ref, qmax_ref,
                   a_ref, m_ref, l_ref, b_ref, *, n_valid, n_padded, scale):
    half = pl.program_id(0)
    t = pl.program_id(1)
    tiles_per_half = pl.num_programs(1)
    tile_n = x_ref.shape[0]

    @pl.when(t == 0)
    def _():
        m_ref[...] = jnp.full(m_ref.shape, _NEG_INIT, F32)
        l_ref[...] = jnp.zeros(l_ref.shape, F32)
        b_ref[...] = jnp.zeros(b_ref.shape, F32)

    x = x_ref[...]                                           # (TN, K) bf16
    q = _q_net(x, wq1_ref[...], bq1_ref[...], wq2_ref[...], bq2_ref[...])   # (TN,H) f32
    # attention logits with N on the lane axis: (C, TN)
    s = _dot(qmax_ref[...], q.astype(BF16), ((1,), (1,))) * scale
    a_ref[...] = s                                           # raw logits, lane-dense store

    if n_valid < n_padded:                                   # mask padded tail instances
        start = (half * tiles_per_half + t) * tile_n
        col = start + lax.broadcasted_iota(jnp.int32, s.shape, 1)
        s = jnp.where(col < n_valid, s, -jnp.inf)

    m_old = m_ref[0]                                         # (C, 1)
    m_new = jnp.maximum(m_old, jnp.max(s, axis=1, keepdims=True))
    alpha = jnp.exp(m_old - m_new)                           # (C, 1)
    p = jnp.exp(s - m_new)                                   # (C, TN), in [0, 1]
    l_ref[0] = l_ref[0] * alpha + jnp.sum(p, axis=1, keepdims=True)
    b_ref[0] = b_ref[0] * alpha + _dot(p.astype(BF16), x, ((1,), (0,)))     # (C, K)
    m_ref[0] = m_new


# --------------------------------------------------------------------------- #
# Wrapper
# --------------------------------------------------------------------------- #
def _pick_tile_n(n, k, h):
    # Stage-2 streamed working set per instance: double-buffered bf16 x tile plus
    # f32/bf16 intermediates of the recomputed q-net and the (C, TN) logits.
    row_bytes = 2 * (2 * k) + 12 * h + 4 * 64
    cap = max(128, (10 * 1024 * 1024) // row_bytes)
    want = max(128, pl.next_power_of_2(pl.cdiv(n, 2)))
    for cand in (8192, 4096, 2048, 1024, 512, 256, 128):
        if cand <= cap and cand <= want:
            return cand
    return 128


def milnet_forward(x_bag, params, tile_n=None):
    x = x_bag[0]                                             # squeeze(0): (N, K)
    n, k = x.shape
    c = params["wi"].shape[1]
    hdim = params["wq1"].shape[1]

    if tile_n is None:
        tile_n = _pick_tile_n(n, k, hdim)
    assert tile_n % 128 == 0, "tile_n must be a multiple of 128"

    # Pad N to two equal halves of whole tiles (padded rows masked in stage 2).
    n_pad = int(pl.cdiv(n, 2 * tile_n)) * 2 * tile_n
    tiles_per_half = n_pad // (2 * tile_n)
    n_tiles = 2 * tiles_per_half

    x_bf = x.astype(BF16)
    if n_pad != n:
        x_bf = jnp.pad(x_bf, ((0, n_pad - n), (0, 0)))

    wi_t = jnp.transpose(params["wi"]).astype(BF16)          # (C, K)
    bi_col = jnp.reshape(params["bi"], (c, 1)).astype(F32)   # (C, 1)
    wq1 = params["wq1"].astype(BF16)                         # (K, H)
    bq1 = jnp.reshape(params["bq1"], (1, hdim)).astype(F32)
    wq2 = params["wq2"].astype(BF16)                         # (H, H)
    bq2 = jnp.reshape(params["bq2"], (1, hdim)).astype(F32)
    wfcc = params["wfcc"].astype(F32)                        # (C, C, K)
    bfcc = params["bfcc"].astype(F32)                        # (1, C)

    # ---- Stage 1: instance classifier, fully parallel over N tiles ----
    classes_t = pl.pallas_call(
        _stage1_kernel,
        grid=(n_tiles,),
        in_specs=[
            pl.BlockSpec((tile_n, k), lambda t: (t, 0)),         # x
            pl.BlockSpec((c, k), lambda t: (0, 0)),              # Wi^T
            pl.BlockSpec((c, 1), lambda t: (0, 0)),              # bi (column)
        ],
        out_specs=pl.BlockSpec((c, tile_n), lambda t: (0, t)),   # classes^T
        out_shape=jax.ShapeDtypeStruct((c, n_pad), F32),
        compiler_params=pltpu.CompilerParams(
            dimension_semantics=("parallel",),
            vmem_limit_bytes=_VMEM_LIMIT),
    )(x_bf, wi_t, bi_col)

    classes_valid_t = classes_t[:, :n]                           # (C, N)
    classes = classes_valid_t.T                                  # (N, C)

    # ---- Critical instances + q_max: tiny one-off work, plain JAX ----
    idx = jnp.argmax(classes_valid_t, axis=1)                    # (C,)
    m_feats = x_bf[idx]                                          # (C, K) bf16
    q_max = _q_net(m_feats, wq1, bq1, wq2, bq2).astype(BF16)     # (C, H)

    scale = 1.0 / math.sqrt(float(hdim))
    kernel2 = functools.partial(_stage2_kernel, n_valid=n, n_padded=n_pad,
                                scale=scale)

    # ---- Stage 2: 2 halves (parallel -> both v7x cores) x flash pass over tiles ----
    a_logits, m_h, l_h, bacc_h = pl.pallas_call(
        kernel2,
        grid=(2, tiles_per_half),
        in_specs=[
            pl.BlockSpec((tile_n, k),
                         lambda hh, t: (hh * tiles_per_half + t, 0)),    # x
            pl.BlockSpec((k, hdim), lambda hh, t: (0, 0)),               # Wq1
            pl.BlockSpec((1, hdim), lambda hh, t: (0, 0)),               # bq1
            pl.BlockSpec((hdim, hdim), lambda hh, t: (0, 0)),            # Wq2
            pl.BlockSpec((1, hdim), lambda hh, t: (0, 0)),               # bq2
            pl.BlockSpec((c, hdim), lambda hh, t: (0, 0)),               # q_max
        ],
        out_specs=(
            pl.BlockSpec((c, tile_n),
                         lambda hh, t: (0, hh * tiles_per_half + t)),    # logits (C, N)
            pl.BlockSpec((1, c, 1), lambda hh, t: (hh, 0, 0)),           # m per half
            pl.BlockSpec((1, c, 1), lambda hh, t: (hh, 0, 0)),           # l per half
            pl.BlockSpec((1, c, k), lambda hh, t: (hh, 0, 0)),           # B acc per half
        ),
        out_shape=(
            jax.ShapeDtypeStruct((c, n_pad), F32),
            jax.ShapeDtypeStruct((2, c, 1), F32),
            jax.ShapeDtypeStruct((2, c, 1), F32),
            jax.ShapeDtypeStruct((2, c, k), F32),
        ),
        compiler_params=pltpu.CompilerParams(
            dimension_semantics=("parallel", "arbitrary"),
            vmem_limit_bytes=_VMEM_LIMIT),
    )(x_bf, wq1, bq1, wq2, bq2, q_max)

    # ---- Merge the two halves, finalize softmax / B / bag logits (tiny, XLA) ----
    m_g = jnp.max(m_h, axis=0)                                   # (C, 1)
    w = jnp.exp(m_h - m_g)                                       # (2, C, 1)
    l_g = jnp.sum(l_h * w, axis=0)                               # (C, 1)
    b = jnp.sum(bacc_h * w, axis=0) / l_g                        # (C, K)

    a = jax.nn.softmax(a_logits[:, :n], axis=1).T                # (N, C), exact softmax
    pred = jnp.einsum("oik,ik->o", wfcc, b)[None, :] + bfcc      # (1, C) bag logits
    return classes, pred, a, b[None]                             # (N,C),(1,C),(N,C),(1,C,K)


# --------------------------------------------------------------------------- #
# Pure-JAX reference (mirrors the kernel's bf16-MXU-operand / f32-accum policy)
# --------------------------------------------------------------------------- #
def milnet_reference(x_bag, params):
    x = x_bag[0].astype(BF16)
    wi = params["wi"].astype(BF16)
    wq1 = params["wq1"].astype(BF16)
    wq2 = params["wq2"].astype(BF16)
    bi, bq1, bq2 = params["bi"], params["bq1"], params["bq2"]
    wfcc, bfcc = params["wfcc"], params["bfcc"]

    dot = lambda a, b: jnp.dot(a, b, preferred_element_type=F32)
    classes = dot(x, wi) + bi                                    # (N, C) f32

    def q_net(v):
        hh = jnp.maximum(dot(v, wq1) + bq1, 0.0)
        return jnp.tanh(dot(hh.astype(BF16), wq2) + bq2)

    q = q_net(x)                                                 # (N, H) f32
    idx = jnp.argmax(classes, axis=0)                            # m_indices[0, :]
    m_feats = x[idx]                                             # (C, K)
    q_max = q_net(m_feats)                                       # (C, H)
    s = dot(q.astype(BF16), q_max.astype(BF16).T) / jnp.sqrt(F32(q.shape[1]))
    a = jax.nn.softmax(s, axis=0)                                # (N, C)
    b = jnp.einsum("nc,nk->ck", a, x.astype(F32))                # (C, K)
    pred = jnp.einsum("oik,ik->o", wfcc, b)[None, :] + bfcc      # (1, C)
    return classes, pred, a, b[None]


def init_params(key, k=256, c=4, h=128):
    ks = jax.random.split(key, 7)
    rnd = lambda kk, shape, s: (s * jax.random.normal(kk, shape)).astype(F32)
    return dict(
        wi=rnd(ks[0], (k, c), 0.1),
        bi=rnd(ks[1], (1, c), 0.01),
        wq1=rnd(ks[2], (k, h), 0.1),
        bq1=rnd(ks[3], (1, h), 0.01),
        wq2=rnd(ks[4], (h, h), 0.05),
        bq2=rnd(ks[5], (1, h), 0.01),
        wfcc=rnd(ks[6], (c, c, k), 0.1),
        bfcc=jnp.full((1, c), 0.01, F32),
    )


if __name__ == "__main__":
    N, K, C, H = 300, 256, 4, 128            # instances, feat size, classes, q-hidden
    key = jax.random.PRNGKey(0)
    kx, kp = jax.random.split(key)
    x_bag = jax.random.normal(kx, (1, N, K), dtype=F32)   # torch input: 1 x N x K
    params = init_params(kp, k=K, c=C, h=H)

    # tile_n=128 -> N padded to 512, 4 tiles (2 per half): exercises the pipelined
    # grid, the megacore half split, and the padded-tail masking path.
    outs = milnet_forward(x_bag, params, tile_n=128)
    jax.block_until_ready(outs)

    refs = milnet_reference(x_bag, params)
    names = ("classes", "prediction_bag", "A", "B")
    tol = {"classes": 2e-2, "prediction_bag": 5e-2, "A": 2e-2, "B": 2e-2}
    for name, got, want in zip(names, outs, refs):
        assert got.shape == want.shape, (name, got.shape, want.shape)
        assert jnp.allclose(got, want, atol=tol[name], rtol=tol[name]), f"mismatch: {name}"

    print("KERNEL_OK")
</pallas_src>

<mosaic_0001>
module attributes {stable_mosaic.version = 11 : i64} {
  func.func @_stage1_kernel(%arg0: i32, %arg1: memref<128x256xbf16, #tpu.memory_space<vmem>>, %arg2: memref<4x256xbf16, #tpu.memory_space<vmem>>, %arg3: memref<4x1xf32, #tpu.memory_space<vmem>>, %arg4: memref<4x128xf32, #tpu.memory_space<vmem>>) attributes {dimension_semantics = [#tpu.dimension_semantics<parallel>], iteration_bounds = array<i64: 4>, scalar_prefetch = 0 : i64, scratch_operands = 0 : i64, tpu.core_type = #tpu.core_type<tc>, window_params = [{transform_indices = @transform_0, window_bounds = array<i64: 128, 256>}, {pipeline_mode = #tpu.pipeline_mode<synchronous>, transform_indices = @transform_1, window_bounds = array<i64: 4, 256>}, {pipeline_mode = #tpu.pipeline_mode<synchronous>, transform_indices = @transform_2, window_bounds = array<i64: 4, 1>}, {transform_indices = @transform_3, window_bounds = array<i64: 4, 128>}]} {
    %c0 = arith.constant 0 : index
    %c0_0 = arith.constant 0 : index
    %0 = vector.load %arg1[%c0, %c0_0] : memref<128x256xbf16, #tpu.memory_space<vmem>>, vector<128x256xbf16>
    %c0_1 = arith.constant 0 : index
    %c0_2 = arith.constant 0 : index
    %1 = vector.load %arg2[%c0_1, %c0_2] : memref<4x256xbf16, #tpu.memory_space<vmem>>, vector<4x256xbf16>
    %cst = arith.constant dense<0.000000e+00> : vector<4x128xf32>
    %2 = tpu.matmul %1, %0, %cst {dimension_numbers = #tpu.dot_dimension_numbers<[1], [1], [0], [0], [0, 0, 1, 0], [], []>} : vector<4x256xbf16>, vector<128x256xbf16>, vector<4x128xf32> -> vector<4x128xf32>
    %c0_3 = arith.constant 0 : index
    %c0_4 = arith.constant 0 : index
    %3 = vector.load %arg3[%c0_3, %c0_4] : memref<4x1xf32, #tpu.memory_space<vmem>>, vector<4x1xf32>
    %4 = vector.broadcast %3 : vector<4x1xf32> to vector<4x128xf32>
    %5 = arith.addf %2, %4 : vector<4x128xf32>
    %c0_5 = arith.constant 0 : index
    %c0_6 = arith.constant 0 : index
    %6 = vector.load %arg4[%c0_5, %c0_6] : memref<4x128xf32, #tpu.memory_space<vmem>>, vector<4x128xf32>
    tpu.vector_store %arg4[%c0_5, %c0_6], %5 {strides = array<i32>} : memref<4x128xf32, #tpu.memory_space<vmem>>, vector<4x128xf32>,
    return
  }
  func.func @transform_0(%arg0: i32) -> (i32, i32) {
    %c0_i32 = arith.constant 0 : i32
    %c0_i32_0 = arith.constant 0 : i32
    return %arg0, %c0_i32 : i32, i32
  }
  func.func @transform_1(%arg0: i32) -> (i32, i32) {
    %c0_i32 = arith.constant 0 : i32
    %c0_i32_0 = arith.constant 0 : i32
    %c0_i32_1 = arith.constant 0 : i32
    return %c0_i32, %c0_i32_0 : i32, i32
  }
  func.func @transform_2(%arg0: i32) -> (i32, i32) {
    %c0_i32 = arith.constant 0 : i32
    %c0_i32_0 = arith.constant 0 : i32
    %c0_i32_1 = arith.constant 0 : i32
    return %c0_i32, %c0_i32_0 : i32, i32
  }
  func.func @transform_3(%arg0: i32) -> (i32, i32) {
    %c0_i32 = arith.constant 0 : i32
    %c0_i32_0 = arith.constant 0 : i32
    return %c0_i32, %arg0 : i32, i32
  }
}

</mosaic_0001>

<bundles_post_ra>
// kernel: tpu_custom_call.1
= control target key start
LH: loop header
LB: loop body
LE: loop exit
PB: predicated region body
PF: predicated region fallthrough
CT: control target
= control target key end

     0   :  { %8 = vsyncpa [#allocation3], 0  ;;  %s844_s0 = inlined_call_operand.hbm [shape: bf16[512,256], index: 0, kind: input, shape index: {}]   ;;  %s845_s1 = inlined_call_operand.vmem [shape: bf16[4,256], index: 1, kind: input, shape index: {}]   ;;  %s846_s2 = inlined_call_operand.vmem [shape: f32[4,1], index: 2, kind: input, shape index: {}]   ;;  %s847_s3 = inlined_call_operand.hbm [shape: f32[4,512], index: 3, kind: output, shape index: {}]  }
   0x1   :  { %10 = vsyncpa [#allocation3 + $0x1], 0 }
   0x2   :  { %11 = vsyncpa [#allocation4], 0 }
   0x3   :  { %13 = vsyncpa [#allocation4 + $0x1], 0  ;;  %s661_s12 = smov 0   ;;  %s663_s13 = smov 0  }
   0x4   :  { %s665_s14 = smov 0   ;;  %s667_s15 = smov 0  }
   0x5 LB: > { %s682_s16 = sadd.s32 4294967295, %s634_s15   ;;  %s431_s17 = sadd.s32 4294967294, %s634_s15   ;;  %s634_s15 = sphi %s667_s15, %s859_s15   ;;  %s630_s14 = sphi %s665_s14, %s858_s14   ;;  %s626_s13 = sphi %s663_s13, %s857_s13   ;;  %s622_s12 = sphi %s661_s12, %s856_s12  }
   0x6   : > { %s686_s18 = sadd.s32 1, %s634_s15   ;;  %s26_s19 = sadd.s32 1, %s630_s14 }
   0x7   : > { %s23_s20 = ssub.s32 %s634_s15, %s686_s18  ;;  %p33_p0 = scmp.ne.s32.totalorder %s630_s14, %s626_s13 }
   0x8   : > { %p24_p1 = scmp.eq.s32.totalorder %s23_s20, 0  ;;  %p34_p2 = scmp.eq.s32.totalorder %s634_s15, 0 }
   0x9   : > { %p39_p3 = scmp.ne.s32.totalorder %s626_s13, %s622_s12  ;;  %p40_p4 = scmp.eq.s32.totalorder %s682_s16, 0 }
   0xa   : > { %s698_s21 = scalar_select %p24_p1, %s630_s14, %s26_s19  }
   0xb   : > { %p700_p5 = por %p34_p2, %p33_p0  ;;  %p704_p6 = por %p40_p4, %p39_p3 }
   0xc   : > { %p105_p7 = scmp.eq.s32.totalorder %s682_s16, 3  ;;  %p111_p8 = scmp.eq.s32.totalorder %s431_s17, 3 }
   0xd   : > { %p476_p9 = scmp.lt.s32.totalorder %s634_s15, 4  ;;  %s137_s26 = sand.u32 1, %s630_s14  }
   0xe   : > { %p710_p10 = por %p105_p7, %p33_p0  ;;  %p714_p11 = por %p111_p8, %p39_p3 }
   0xf   : > { %s463_s27 = sshll.u32 %s634_s15, 11  ;;  %s434_s28 = sshll.u32 %s137_s26, 7 }
  0x10   : > { %s851_s24 = scalar_select %p710_p10, 1, 0 }
  0x11   : > { %s852_s25 = scalar_select %p714_p11, 1, 0 }
  0x12   : > { %s723_s4 = scalar_lea.hbm %s844_s0, %s463_s27  ;;  %s141_s5 = scalar_lea.vmem [#allocation2], %s434_s28 }
  0x13   : > { %s149_s6 = sshll.u32 %s141_s5, 4  ;;  %p727_p12 = pnand %p476_p9, %p700_p5  ;;  %s731_s6 = int_to_ptr.vmem [resolvable:$true] %s149_s6 }
  0x14   : > { %s733_s8 = scalar_lea.sflag [#allocation3], %s137_s26  ;;  %s538_s9 = scalar_lea.hbm %s723_s4, 2048 }
  0x15   : > { %p539_p13 = scmp.ne.s32.totalorder %s723_s4, %s538_s9  ;;  %p540_p0 = pneg %p727_p12 }
  0x16   : > { %s543_s17 = scalar_lea.hbm %s844_s0, 8192  ;;  %p544_p3 = scmp.lt.u32.totalorder %s723_s4, %s844_s0 }
  0x17   : > { %p541_p1 = pnand %p540_p0, %p539_p13  ;;  %p545_p4 = scmp.lt.u32.totalorder %s543_s17, %s538_s9 }
  0x18   : > { %p547_p7 = scmp.lt.u32.totalorder %s538_s9, %s723_s4 }
  0x19   : > { %p542_p2 = pneg %p541_p1  ;;  %p546_p5 = por %p545_p4, %p544_p3 }
  0x1b   : > { %p548_p8 = por %p547_p7, %p546_p5 }
  0x1d   : > { %p549_p9 = pnand %p548_p8, %p542_p2 }
  0x1f   : > { %552 = shalt.err (!%p549_p9)
}
  0x20   : > { %s553_s22 = scalar_lea.vmem %s731_s6, 2048  ;;  %s636_s26 = smov [#allocation2]  }
  0x21   : > { %p554_p13 = scmp.ne.s32.totalorder %s731_s6, %s553_s22  ;;  %s558_s27 = sshll.u32 %s636_s26, 4  ;;  %s559_s27 = int_to_ptr.vmem [resolvable:$false] %s558_s27 }
  0x22   : > { %s560_s28 = scalar_lea.vmem %s559_s27, 4096  ;;  %p561_p10 = scmp.lt.s32.totalorder %s731_s6, %s559_s27 }
  0x23   : > { %p556_p1 = pnand %p554_p13, %p540_p0  ;;  %p562_p3 = scmp.lt.s32.totalorder %s560_s28, %s553_s22 }
  0x25   : > { %p557_p11 = pneg %p556_p1  ;;  %p563_p4 = por %p562_p3, %p561_p10 }
  0x27   : > { %p564_p5 = pnand %p563_p4, %p557_p11 }
  0x29   : > { %567 = shalt.err (!%p564_p5)
}
  0x2a   : > { %s637_s29 = smov 128   ;;  %s638_s30 = smov 8  }
  0x2b   : > { %471 = dma.hbm_to_vmem [thread:$0]  (!%p727_p12), %s723_s4, 2048, %s731_s6, %s733_s8, %s637_s29, %s637_s29, %s638_s30  }
  0x2c   : > { %p438_p0 = scmp.ge.s32.totalorder %s634_s15, 1  ;;  %p157_p2 = scmp.lt.s32.totalorder %s634_s15, 5 }
  0x2e   : > { %p158_p7 = pnand %p438_p0, %p157_p2 }
  0x2f   : > { %s764_s5 = sand.u32 (!%p158_p7), 1, %s626_s13  }
  0x30   : > { %161 = sbr.rel (%p158_p7) target bundleno = 349 (0x15d), region = 32  ;;  %s439_s9 = sshll.u32 (!%p158_p7), %s764_s5, 7 }
  0x31   : > { %s164_s10 = scalar_lea.sflag (!%p158_p7), [#allocation3], %s764_s5  ;;  %s768_s11 = scalar_lea.vmem (!%p158_p7), [#allocation2], %s439_s9 }
  0x37   : > { %613 = dma.done.wait (%p704_p6), %s164_s10, 2048  }
  0x38   : > { %615 = vsyncadd (%p704_p6), %s164_s10, 4294965248  ;;  %v639_v0 = vmov 0   ;;  %v514_v1 = vld [vmem:[%s768_s11 + $0x4] ss:$8 sps:$4 sm:$0xff]   ;;  %v516_v2 = vld [vmem:[%s768_s11] ss:$8 sps:$4 sm:$0xff]  }
  0x39   : > { %513 = vset.pattern.permute.xlu0 %v639_v0  ;;  %306 = vmatprep.subr.bf16.mxu0 %v514_v1  ;;  %v517_v3 = vld [vmem:[%s768_s11 + $0x14] ss:$8 sps:$4 sm:$0xff]   ;;  %v519_v4 = vld [vmem:[%s768_s11 + $0x10] ss:$8 sps:$4 sm:$0xff]   ;;  %v520_v5 = vld [vmem:[%s768_s11 + $0x24] ss:$8 sps:$4 sm:$0xff]  }
  0x3a   : > { %307 = vmatpush1.bf16.xpose.msra.mxu0 %v516_v2  ;;  %v209_v6 = vld [vmem:[%s846_s2] sm:$0xf]  ;;  %v523_v10 = vld [vmem:[%s768_s11 + $0x34] ss:$8 sps:$4 sm:$0xff]   ;;  %v525_v11 = vld [vmem:[%s768_s11 + $0x30] ss:$8 sps:$4 sm:$0xff]  }
  0x3b   : > { %308 = vmatprep.subr.bf16.mxu0 %v517_v3  ;;  %v441_v7 = vld.sshfl [vmem:[%s845_s1] sm:$0x33 pattern:$0x76325410]  ;;  %212 = vperm.xlu0 %513, %v209_v6   ;;  %v526_v12 = vld [vmem:[%s768_s11 + $0x44] ss:$8 sps:$4 sm:$0xff]  }
  0x3c   : > { %v223_v8 = vcombine.high %v441_v7, %v441_v7  ;;  %v522_v9 = vld [vmem:[%s768_s11 + $0x20] ss:$8 sps:$4 sm:$0xff]   ;;  %v529_v14 = vld [vmem:[%s768_s11 + $0x54] ss:$8 sps:$4 sm:$0xff]   ;;  %v531_v15 = vld [vmem:[%s768_s11 + $0x50] ss:$8 sps:$4 sm:$0xff]  }
  0x3d   : > { %v528_v13 = vld [vmem:[%s768_s11 + $0x40] ss:$8 sps:$4 sm:$0xff]   ;;  %v532_v16 = vld [vmem:[%s768_s11 + $0x64] ss:$8 sps:$4 sm:$0xff]   ;;  %v535_v18 = vld [vmem:[%s768_s11 + $0x74] ss:$8 sps:$4 sm:$0xff]  }
  0x3e   : > { %338 = vmatprep.mubr.bf16.mxu0 %v223_v8  ;;  %v534_v17 = vld [vmem:[%s768_s11 + $0x60] ss:$8 sps:$4 sm:$0xff]   ;;  %v537_v19 = vld [vmem:[%s768_s11 + $0x70] ss:$8 sps:$4 sm:$0xff]   ;;  %s440_s8 = sshll.u32 %s764_s5, 2  ;;  %s459_s17 = sshll.u32 %s682_s16, 6 }
  0x3f   : > { %s189_s19 = scalar_lea.vmem [#allocation5], %s440_s8  ;;  %s801_s27 = scalar_lea.hbm %s847_s3, %s459_s17 }
  0x40   : > { %s361_s20 = sshll.u32 %s189_s19, 4  ;;  %s348_s28 = scalar_lea.sflag [#allocation4], %s764_s5  ;;  %s803_s20 = int_to_ptr.vmem [resolvable:$true] %s361_s20 }
  0x41   : > { %s568_s16 = scalar_lea.vmem %s803_s20, 64  ;;  %p854_p10 = scmp.ne.s32.totalorder %s851_s24, 0 }
  0x42   : > { %309 = vmatpush1.bf16.xpose.msra.mxu0 %v519_v4  ;;  %p569_p6 = scmp.ne.s32.totalorder %s803_s20, %s568_s16  ;;  %s640_s29 = smov [#allocation5]  }
  0x43   : > { %310 = vmatprep.subr.bf16.mxu0 %v520_v5  ;;  %s572_s30 = sshll.u32 %s640_s29, 4  ;;  %s573_s30 = int_to_ptr.vmem [resolvable:$false] %s572_s30 }
  0x44   : > { %p570_p11 = pnand %p569_p6, %p854_p10  ;;  %s574_s9 = scalar_lea.vmem %s573_s30, 128 }
  0x45   : > { %p575_p8 = scmp.lt.s32.totalorder %s803_s20, %s573_s30  ;;  %p576_p9 = scmp.lt.s32.totalorder %s574_s9, %s568_s16 }
  0x46   : > { %p571_p12 = pneg %p570_p11 }
  0x47   : > { %p577_p13 = por %p576_p9, %p575_p8 }
  0x49   : > { %p578_p1 = pnand %p577_p13, %p571_p12 }
  0x4a   : > { %311 = vmatpush1.bf16.xpose.msra.mxu0 %v522_v9 }
  0x4b   : > { %312 = vmatprep.subr.bf16.mxu0 %v523_v10 }
  0x52   : > { %313 = vmatpush1.bf16.xpose.msra.mxu0 %v525_v11 }
  0x53   : > { %314 = vmatprep.subr.bf16.mxu0 %v526_v12 }
  0x5a   : > { %315 = vmatpush1.bf16.xpose.msra.mxu0 %v528_v13 }
  0x5b   : > { %316 = vmatprep.subr.bf16.mxu0 %v529_v14 }
  0x62   : > { %317 = vmatpush1.bf16.xpose.msra.mxu0 %v531_v15 }
  0x63   : > { %318 = vmatprep.subr.bf16.mxu0 %v532_v16 }
  0x6a   : > { %319 = vmatpush1.bf16.xpose.msra.mxu0 %v534_v17 }
  0x6b   : > { %320 = vmatprep.subr.bf16.mxu0 %v535_v18 }
  0x72   : > { %321 = vmatpush1.bf16.xpose.msra.mxu0 %v537_v19 }
  0x79   : > { %339 = vmatmul.mubr.bf16.vlgmr.msra.gmra.mrb[0].mxu0 %v441_v7 }
  0xba   : > { %v213_v20 = vpop.permute.xlu0 %212 }
 0x14c   : > { %v340_v21 = vpop.f32.mrb[0].mxu0 }
 0x14d   : > { %v341_v22 = vadd.f32 %v340_v21, %v213_v20  ;;  %v342_v23 = vpop.f32.mrb[1].mxu0 }
 0x14e   : > { %v343_v24 = vpop.f32.mrb[2].mxu0 }
 0x14f   : > { %346 = vst [vmem:[%s189_s19] sm:$0xf] %v341_v22  ;;  %v344_v25 = vpop.f32.mrb[3].mxu0 }
 0x150   : > { %581 = shalt.err (!%p578_p1)
}
 0x151   : > { %s582_s5 = scalar_lea.hbm %s801_s27, 64  ;;  %s586_s23 = scalar_lea.hbm %s847_s3, 256 }
 0x152   : > { %p583_p3 = scmp.ne.s32.totalorder %s801_s27, %s582_s5  ;;  %p587_p0 = scmp.lt.u32.totalorder %s801_s27, %s847_s3 }
 0x153   : > { %p588_p2 = scmp.lt.u32.totalorder %s586_s23, %s582_s5  ;;  %p590_p6 = scmp.lt.u32.totalorder %s582_s5, %s801_s27 }
 0x154   : > { %p584_p4 = pnand %p583_p3, %p854_p10 }
 0x155   : > { %p589_p7 = por %p588_p2, %p587_p0 }
 0x156   : > { %p585_p5 = pneg %p584_p4 }
 0x157   : > { %p591_p11 = por %p590_p6, %p589_p7 }
 0x159   : > { %p592_p12 = pnand %p591_p11, %p585_p5 }
 0x15b   : > { %595 = shalt.err (!%p592_p12)
}
 0x15c   : > { %466 = dma.vmem_to_hbm [thread:$0]  (%p854_p10), %s803_s20, 64, %s801_s27, %s348_s28  }
 0x15d PF: > { %p477_p8 = scmp.ge.s32.totalorder %s634_s15, 2  ;;  %s373_s7 = sand.u32 1, %s622_s12  }
 0x15e   : > { %p855_p9 = scmp.ne.s32.totalorder %s852_s25, 0  ;;  %s374_s8 = scalar_lea.sflag [#allocation4], %s373_s7 }
 0x160   : > { %p473_p13 = pnand %p477_p8, %p855_p9 }
 0x162   : > { %617 = dma.done.wait (!%p473_p13), %s374_s8, 64  }
 0x163   : > { %619 = vsyncadd (!%p473_p13), %s374_s8, 4294967232  ;;  %p16_p1 = scmp.ge.s32.totalorder %s686_s18, 6   ;;  %s856_s12 = smov %s626_s13 }
 0x164   : > { %s857_s13 = smov %s630_s14  ;;  %s858_s14 = smov %s698_s21 }
 0x165   : > { %s859_s15 = smov %s686_s18  ;;  %18 = sbr.rel (!%p16_p1) target bundleno = 5 (0x5), region = 77 }
 0x16c   :  { %379 = vsyncpa [#allocation3], 1 }
 0x16d   :  { %381 = vsyncpa [#allocation3 + $0x1], 1 }
 0x16e   :  { %382 = vsyncpa [#allocation4], 1 }
 0x16f   :  { %384 = vsyncpa [#allocation4 + $0x1], 1 }

</bundles_post_ra>
